<compile_context>
chip_gen: v7x
topology: tpu7x:2x2x1
jax: 0.10.0
libtpu: 0.0.40
codegen_flags: <defaults>
</compile_context>

<pallas_src>
import functools

import jax
import jax.numpy as jnp
from jax.experimental import pallas as pl
from jax.experimental.pallas import tpu as pltpu


def _critic_kernel(x_ref, m1_ref, b1_ref, m2_ref, b2_ref, w3_ref, pd_ref,
                   scal_ref, out_ref):
    """One batch block: x_ref is (C*T, block_b*A); lanes index (batch, asset)."""
    x = x_ref[...]                                              # (C*T, Nb)

    # conv1 (1x1): left-multiply by kron(W1, I_T) on the MXU; bias+ReLU on VPU.
    h1 = jnp.dot(m1_ref[...], x, preferred_element_type=jnp.float32)
    h1 = jnp.maximum(h1 + b1_ref[...], 0.0)                     # (C*T, Nb)

    # conv2 (1x1): left-multiply by kron(W2, I_T).
    h2 = jnp.dot(m2_ref[...], h1, preferred_element_type=jnp.float32)
    h2 = jnp.maximum(h2 + b2_ref[...], 0.0)                     # (T*T, Nb)

    # conv3 (1xT) + width pooling: a single sublane contraction against the
    # flattened w3 row (no reshape/relayout pooling needed).
    s = jnp.dot(w3_ref[...], h2, preferred_element_type=jnp.float32)  # (1, Nb)
    h3 = jnp.maximum(s + scal_ref[0], 0.0)                      # + b3, ReLU

    # dense over assets: lane contraction against kron(I_block_b, wd) gives a
    # lane-dense (1, block_b) result directly.
    y = jnp.dot(h3, pd_ref[...], preferred_element_type=jnp.float32) + scal_ref[1]
    out_ref[...] = y                                            # (1, block_b)


def prepare_critic_params(params, block_b):
    """Batch-independent weight prep, hoisted out of the forward (done once)."""
    w1, b1, w2, b2, w3, b3, wd, bd = params
    C = w1.shape[0]
    T = w2.shape[0]
    A = wd.shape[1]
    f32 = jnp.float32
    eye_t = jnp.eye(T, dtype=f32)
    m1 = jnp.kron(w1[:, :, 0, 0].astype(f32), eye_t)            # (C*T, C*T)
    m2 = jnp.kron(w2[:, :, 0, 0].astype(f32), eye_t)            # (T*T, C*T)
    b1c = jnp.repeat(b1.astype(f32), T).reshape(C * T, 1)       # (C*T, 1)
    b2c = jnp.repeat(b2.astype(f32), T).reshape(T * T, 1)       # (T*T, 1)
    w3r = w3[0, :, 0, :].astype(f32).reshape(1, T * T)          # (1, T*T)
    pd = jnp.kron(jnp.eye(block_b, dtype=f32),
                  wd.astype(f32).reshape(A, 1))                 # (block_b*A, block_b)
    scal = jnp.concatenate([b3, bd]).astype(f32)                # (2,) -> SMEM
    return (m1, b1c, m2, b2c, w3r, pd, scal)


def default_block_b(B, A, target_lanes=2048):
    """Largest divisor of B whose per-step lane block (block_b*A) fits target."""
    best = 1
    for d in range(1, B + 1):
        if B % d == 0 and d * A <= target_lanes:
            best = d
    return best


@functools.partial(jax.jit, static_argnames=("block_b",))
def critic_forward(x, prepped, *, block_b):
    """x: (B, C, A, T) float32 (NCHW, PyTorch layout).  Returns (B,)."""
    B, C, A, T = x.shape
    assert B % block_b == 0, (B, block_b)
    m1, b1c, m2, b2c, w3r, pd, scal = prepped
    CT, TT = C * T, T * T
    nb = B // block_b
    n_lanes = block_b * A

    # Lane-dense layout: sublanes = (channel, width), lanes = (batch, asset).
    xl = x.astype(jnp.float32).transpose(1, 3, 0, 2).reshape(CT, B * A)

    y = pl.pallas_call(
        _critic_kernel,
        grid=(nb,),
        in_specs=[
            pl.BlockSpec((CT, n_lanes), lambda i: (0, i)),        # x batch-block
            pl.BlockSpec((CT, CT), lambda i: (0, 0)),             # kron(W1, I_T)
            pl.BlockSpec((CT, 1), lambda i: (0, 0)),              # b1
            pl.BlockSpec((TT, CT), lambda i: (0, 0)),             # kron(W2, I_T)
            pl.BlockSpec((TT, 1), lambda i: (0, 0)),              # b2
            pl.BlockSpec((1, TT), lambda i: (0, 0)),              # w3 row
            pl.BlockSpec((n_lanes, block_b), lambda i: (0, 0)),   # kron(I, wd)
            pl.BlockSpec(memory_space=pltpu.MemorySpace.SMEM),    # [b3, bd]
        ],
        out_specs=pl.BlockSpec((None, 1, block_b), lambda i: (i, 0, 0)),
        out_shape=jax.ShapeDtypeStruct((nb, 1, block_b), jnp.float32),
        compiler_params=pltpu.CompilerParams(
            dimension_semantics=("parallel",),     # megacore split over batch blocks
            vmem_limit_bytes=32 * 1024 * 1024,     # actual use << 4 MiB; safe on v7x
        ),
    )(xl, m1, b1c, m2, b2c, w3r, pd, scal)
    return y.reshape(-1)


def init_params(key, C, A, T):
    """Deterministic PyTorch-style uniform init (synthetic, not a checkpoint)."""
    ks = jax.random.split(key, 8)

    def u(k, shape, fan_in):
        b = 1.0 / jnp.sqrt(jnp.float32(fan_in))
        return jax.random.uniform(k, shape, jnp.float32, -b, b)

    w1 = u(ks[0], (C, C, 1, 1), C)        # conv1
    b1 = u(ks[1], (C,), C)
    w2 = u(ks[2], (T, C, 1, 1), C)        # conv2
    b2 = u(ks[3], (T,), C)
    w3 = u(ks[4], (1, T, 1, T), T * T)    # conv3
    b3 = u(ks[5], (1,), T * T)
    wd = u(ks[6], (1, A), A)              # dense
    bd = u(ks[7], (1,), A)
    return (w1, b1, w2, b2, w3, b3, wd, bd)


def critic_ref(x, params):
    """Pure-JAX reference replicating the PyTorch forward (float32)."""
    w1, b1, w2, b2, w3, b3, wd, bd = params
    hp = jax.lax.Precision.HIGHEST
    h = jax.nn.relu(jnp.einsum('oi,bihw->bohw', w1[:, :, 0, 0], x, precision=hp)
                    + b1[None, :, None, None])
    h = jax.nn.relu(jnp.einsum('oi,bihw->bohw', w2[:, :, 0, 0], h, precision=hp)
                    + b2[None, :, None, None])
    h = jax.nn.relu(jnp.einsum('it,biat->ba', w3[0, :, 0, :], h, precision=hp)
                    + b3[0])
    return jnp.dot(h, wd[0], precision=hp) + bd[0]


if __name__ == "__main__":
    # batch, in_channels, num_assets, trading_window_size
    B, C, A, T = 16, 4, 16, 8
    # 2 batch blocks of 8 -> 128-lane x blocks and grid=(2,) (both v7x TCs busy).
    block_b = 8

    key = jax.random.PRNGKey(0)
    kx, kp = jax.random.split(key)
    x = jax.random.normal(kx, (B, C, A, T), jnp.float32)
    params = init_params(kp, C, A, T)
    prepped = prepare_critic_params(params, block_b)   # hoisted, done once

    y = jax.block_until_ready(critic_forward(x, prepped, block_b=block_b))
    y_ref = critic_ref(x, params)

    assert y.shape == (B,), y.shape
    assert jnp.allclose(y, y_ref, atol=1e-3, rtol=1e-3), (y, y_ref)
    print("KERNEL_OK")
</pallas_src>

<mosaic_0001>
module attributes {stable_mosaic.version = 11 : i64} {
  func.func @_critic_kernel(%arg0: i32, %arg1: memref<32x128xf32, #tpu.memory_space<vmem>>, %arg2: memref<32x32xf32, #tpu.memory_space<vmem>>, %arg3: memref<32x1xf32, #tpu.memory_space<vmem>>, %arg4: memref<64x32xf32, #tpu.memory_space<vmem>>, %arg5: memref<64x1xf32, #tpu.memory_space<vmem>>, %arg6: memref<1x64xf32, #tpu.memory_space<vmem>>, %arg7: memref<128x8xf32, #tpu.memory_space<vmem>>, %arg8: memref<2xf32, #tpu.memory_space<smem>>, %arg9: memref<1x1x8xf32, #tpu.memory_space<vmem>>) attributes {dimension_semantics = [#tpu.dimension_semantics<parallel>], iteration_bounds = array<i64: 2>, scalar_prefetch = 0 : i64, scratch_operands = 0 : i64, tpu.core_type = #tpu.core_type<tc>, window_params = [{transform_indices = @transform_0, window_bounds = array<i64: 32, 128>}, {pipeline_mode = #tpu.pipeline_mode<synchronous>, transform_indices = @transform_1, window_bounds = array<i64: 32, 32>}, {pipeline_mode = #tpu.pipeline_mode<synchronous>, transform_indices = @transform_2, window_bounds = array<i64: 32, 1>}, {pipeline_mode = #tpu.pipeline_mode<synchronous>, transform_indices = @transform_3, window_bounds = array<i64: 64, 32>}, {pipeline_mode = #tpu.pipeline_mode<synchronous>, transform_indices = @transform_4, window_bounds = array<i64: 64, 1>}, {pipeline_mode = #tpu.pipeline_mode<synchronous>, transform_indices = @transform_5, window_bounds = array<i64: 1, 64>}, {pipeline_mode = #tpu.pipeline_mode<synchronous>, transform_indices = @transform_6, window_bounds = array<i64: 128, 8>}, {transform_indices = @transform_7, window_bounds = array<i64: 2>}, {transform_indices = @transform_8, window_bounds = array<i64: 1, 1, 8>}]} {
    %c0 = arith.constant 0 : index
    %c0_0 = arith.constant 0 : index
    %0 = vector.load %arg1[%c0, %c0_0] : memref<32x128xf32, #tpu.memory_space<vmem>>, vector<32x128xf32>
    %c0_1 = arith.constant 0 : index
    %c0_2 = arith.constant 0 : index
    %1 = vector.load %arg2[%c0_1, %c0_2] : memref<32x32xf32, #tpu.memory_space<vmem>>, vector<32x32xf32>
    %cst = arith.constant dense<0.000000e+00> : vector<32x128xf32>
    %2 = tpu.matmul %1, %0, %cst {dimension_numbers = #tpu.dot_dimension_numbers<[1], [0], [0], [1], [0, 0, 1, 1], [], []>} : vector<32x32xf32>, vector<32x128xf32>, vector<32x128xf32> -> vector<32x128xf32>
    %c0_3 = arith.constant 0 : index
    %c0_4 = arith.constant 0 : index
    %3 = vector.load %arg3[%c0_3, %c0_4] : memref<32x1xf32, #tpu.memory_space<vmem>>, vector<32x1xf32>
    %4 = vector.broadcast %3 : vector<32x1xf32> to vector<32x128xf32>
    %5 = arith.addf %2, %4 : vector<32x128xf32>
    %cst_5 = arith.constant 0.000000e+00 : f32
    %6 = vector.broadcast %cst_5 : f32 to vector<32x128xf32>
    %7 = arith.maximumf %5, %6 : vector<32x128xf32>
    %c0_6 = arith.constant 0 : index
    %c0_7 = arith.constant 0 : index
    %8 = vector.load %arg4[%c0_6, %c0_7] : memref<64x32xf32, #tpu.memory_space<vmem>>, vector<64x32xf32>
    %cst_8 = arith.constant dense<0.000000e+00> : vector<64x128xf32>
    %9 = tpu.matmul %8, %7, %cst_8 {dimension_numbers = #tpu.dot_dimension_numbers<[1], [0], [0], [1], [0, 0, 1, 1], [], []>} : vector<64x32xf32>, vector<32x128xf32>, vector<64x128xf32> -> vector<64x128xf32>
    %c0_9 = arith.constant 0 : index
    %c0_10 = arith.constant 0 : index
    %10 = vector.load %arg5[%c0_9, %c0_10] : memref<64x1xf32, #tpu.memory_space<vmem>>, vector<64x1xf32>
    %11 = vector.broadcast %10 : vector<64x1xf32> to vector<64x128xf32>
    %12 = arith.addf %9, %11 : vector<64x128xf32>
    %cst_11 = arith.constant 0.000000e+00 : f32
    %13 = vector.broadcast %cst_11 : f32 to vector<64x128xf32>
    %14 = arith.maximumf %12, %13 : vector<64x128xf32>
    %c0_12 = arith.constant 0 : index
    %c0_13 = arith.constant 0 : index
    %15 = vector.load %arg6[%c0_12, %c0_13] : memref<1x64xf32, #tpu.memory_space<vmem>>, vector<1x64xf32>
    %cst_14 = arith.constant dense<0.000000e+00> : vector<1x128xf32>
    %16 = tpu.matmul %15, %14, %cst_14 {dimension_numbers = #tpu.dot_dimension_numbers<[1], [0], [0], [1], [0, 0, 1, 1], [], []>} : vector<1x64xf32>, vector<64x128xf32>, vector<1x128xf32> -> vector<1x128xf32>
    %c0_15 = arith.constant 0 : index
    %17 = memref.load %arg8[%c0_15] : memref<2xf32, #tpu.memory_space<smem>>
    %18 = vector.broadcast %17 : f32 to vector<1x128xf32>
    %19 = arith.addf %16, %18 : vector<1x128xf32>
    %cst_16 = arith.constant 0.000000e+00 : f32
    %20 = vector.broadcast %cst_16 : f32 to vector<1x128xf32>
    %21 = arith.maximumf %19, %20 : vector<1x128xf32>
    %c0_17 = arith.constant 0 : index
    %c0_18 = arith.constant 0 : index
    %22 = vector.load %arg7[%c0_17, %c0_18] : memref<128x8xf32, #tpu.memory_space<vmem>>, vector<128x8xf32>
    %cst_19 = arith.constant dense<0.000000e+00> : vector<1x8xf32>
    %23 = tpu.matmul %21, %22, %cst_19 {dimension_numbers = #tpu.dot_dimension_numbers<[1], [0], [0], [1], [0, 0, 1, 1], [], []>} : vector<1x128xf32>, vector<128x8xf32>, vector<1x8xf32> -> vector<1x8xf32>
    %c1 = arith.constant 1 : index
    %24 = memref.load %arg8[%c1] : memref<2xf32, #tpu.memory_space<smem>>
    %25 = vector.broadcast %24 : f32 to vector<1x8xf32>
    %26 = arith.addf %23, %25 : vector<1x8xf32>
    %c0_20 = arith.constant 0 : index
    %c0_21 = arith.constant 0 : index
    %c0_22 = arith.constant 0 : index
    %27 = vector.load %arg9[%c0_20, %c0_21, %c0_22] : memref<1x1x8xf32, #tpu.memory_space<vmem>>, vector<1x1x8xf32>
    %28 = vector.shape_cast %27 : vector<1x1x8xf32> to vector<1x8xf32>
    %29 = vector.shape_cast %26 : vector<1x8xf32> to vector<1x1x8xf32>
    tpu.vector_store %arg9[%c0_20, %c0_21, %c0_22], %29 {strides = array<i32>} : memref<1x1x8xf32, #tpu.memory_space<vmem>>, vector<1x1x8xf32>,
    return
  }
  func.func @transform_0(%arg0: i32) -> (i32, i32) {
    %c0_i32 = arith.constant 0 : i32
    %c0_i32_0 = arith.constant 0 : i32
    return %c0_i32, %arg0 : i32, i32
  }
  func.func @transform_1(%arg0: i32) -> (i32, i32) {
    %c0_i32 = arith.constant 0 : i32
    %c0_i32_0 = arith.constant 0 : i32
    %c0_i32_1 = arith.constant 0 : i32
    return %c0_i32, %c0_i32_0 : i32, i32
  }
  func.func @transform_2(%arg0: i32) -> (i32, i32) {
    %c0_i32 = arith.constant 0 : i32
    %c0_i32_0 = arith.constant 0 : i32
    %c0_i32_1 = arith.constant 0 : i32
    return %c0_i32, %c0_i32_0 : i32, i32
  }
  func.func @transform_3(%arg0: i32) -> (i32, i32) {
    %c0_i32 = arith.constant 0 : i32
    %c0_i32_0 = arith.constant 0 : i32
    %c0_i32_1 = arith.constant 0 : i32
    return %c0_i32, %c0_i32_0 : i32, i32
  }
  func.func @transform_4(%arg0: i32) -> (i32, i32) {
    %c0_i32 = arith.constant 0 : i32
    %c0_i32_0 = arith.constant 0 : i32
    %c0_i32_1 = arith.constant 0 : i32
    return %c0_i32, %c0_i32_0 : i32, i32
  }
  func.func @transform_5(%arg0: i32) -> (i32, i32) {
    %c0_i32 = arith.constant 0 : i32
    %c0_i32_0 = arith.constant 0 : i32
    %c0_i32_1 = arith.constant 0 : i32
    return %c0_i32, %c0_i32_0 : i32, i32
  }
  func.func @transform_6(%arg0: i32) -> (i32, i32) {
    %c0_i32 = arith.constant 0 : i32
    %c0_i32_0 = arith.constant 0 : i32
    %c0_i32_1 = arith.constant 0 : i32
    return %c0_i32, %c0_i32_0 : i32, i32
  }
  func.func @transform_7(%arg0: i32) -> i32 {
    %c0_i32 = arith.constant 0 : i32
    %c0_i32_0 = arith.constant 0 : i32
    return %c0_i32 : i32
  }
  func.func @transform_8(%arg0: i32) -> (i32, i32, i32) {
    %c0_i32 = arith.constant 0 : i32
    %c0_i32_0 = arith.constant 0 : i32
    %c0_i32_1 = arith.constant 0 : i32
    return %arg0, %c0_i32, %c0_i32_0 : i32, i32, i32
  }
}

</mosaic_0001>

<bundles_post_ra>
// kernel: critic_forward.1
= control target key start
LH: loop header
LB: loop body
LE: loop exit
PB: predicated region body
PF: predicated region fallthrough
CT: control target
= control target key end

     0   :  { %13 = vsyncpa [#allocation4], 0  ;;  %s1268_s27 = smov 0   ;;  %s1270_s28 = smov 0   ;;  %s1493_s0 = inlined_call_operand.vmem [shape: f32[32,256], index: 0, kind: input, shape index: {}]   ;;  %s1494_s1 = inlined_call_operand.vmem [shape: f32[32,32], index: 1, kind: input, shape index: {}]   ;;  %s1495_s2 = inlined_call_operand.vmem [shape: f32[32,1], index: 2, kind: input, shape index: {}]   ;;  %s1496_s3 = inlined_call_operand.vmem [shape: f32[64,32], index: 3, kind: input, shape index: {}]   ;;  %s1497_s4 = inlined_call_operand.vmem [shape: f32[64,1], index: 4, kind: input, shape index: {}]   ;;  %s1498_s5 = inlined_call_operand.vmem [shape: f32[1,64], index: 5, kind: input, shape index: {}]   ;;  %s1499_s6 = inlined_call_operand.vmem [shape: f32[128,8], index: 6, kind: input, shape index: {}]   ;;  %s1500_s7 = inlined_call_operand.vmem [shape: f32[2], index: 7, kind: input, shape index: {}]   ;;  %s1501_s8 = inlined_call_operand.vmem [shape: f32[2,1,8], index: 8, kind: output, shape index: {}]  }
   0x1   :  { %s1272_s29 = smov 0  }
   0x2 LB: > { %s1284_s30 = sadd.s32 4294967295, %s1216_s29   ;;  %s1287_s9 = sadd.s32 1, %s1216_s29   ;;  %s1216_s29 = sphi %s1272_s29, %s1506_s29   ;;  %s1212_s28 = sphi %s1270_s28, %s1505_s28   ;;  %s1208_s27 = sphi %s1268_s27, %s1504_s27  }
   0x3   : > { %s23_s10 = ssub.s32 %s1216_s29, %s1287_s9  ;;  %s26_s11 = sadd.s32 1, %s1212_s28 }
   0x4   : > { %p24_p0 = scmp.eq.s32.totalorder %s23_s10, 0  ;;  %p33_p1 = scmp.ne.s32.totalorder %s1212_s28, %s1208_s27 }
   0x5   : > { %p34_p2 = scmp.eq.s32.totalorder %s1216_s29, 0  ;;  %p924_p3 = scmp.ge.s32.totalorder %s1216_s29, 1 }
   0x6   : > { %s1297_s12 = scalar_select %p24_p0, %s1212_s28, %s26_s11  }
   0x7   : > { %p1299_p4 = por %p34_p2, %p33_p1  ;;  %p223_p5 = scmp.lt.s32.totalorder %s1216_s29, 3 }
   0x8   : > { %p1142_p6 = scmp.eq.s32.totalorder %s1284_s30, 0  ;;  %s254_s17 = sshll.u32 %s1500_s7, 4  ;;  %s255_s17 = int_to_ptr.vmem [resolvable:$true] %s254_s17 }
   0x9   : > { %p1305_p7 = pnand %p924_p3, %p223_p5  ;;  %s1175_s18 = scalar_lea.vmem %s255_s17, 16 }
   0xa   : > { %p1176_p10 = scmp.ne.s32.totalorder %s255_s17, %s1175_s18  ;;  %p1183_p0 = scmp.lt.s32.totalorder %s255_s17, %s255_s17 }
   0xb   : > { %p1138_p8 = pneg %p1305_p7  ;;  %p1184_p1 = scmp.lt.s32.totalorder %s1175_s18, %s1175_s18 }
   0xd   : > { %p1139_p9 = pnand %p1142_p6, %p1138_p8  ;;  %p1185_p2 = por %p1184_p1, %p1183_p0 }
   0xf   : > { %p1177_p11 = pneg %p1139_p9 }
  0x11   : > { %p1178_p12 = pnand %p1177_p11, %p1176_p10 }
  0x13   : > { %p1179_p13 = pneg %p1178_p12 }
  0x15   : > { %p1186_p3 = pnand %p1185_p2, %p1179_p13 }
  0x17   : > { %1189 = shalt.err (!%p1186_p3)
}
  0x18   : > { %s1218_s19 = smov [#allocation3]   ;;  %p926_p5 = scmp.ge.s32.totalorder %s1216_s29, 2 }
  0x19   : > { %1141 = dma.vmem_to_smem (!%p1139_p9), %s255_s17, 16, %s1218_s19, [#allocation4]  }
  0x1a   : > { %261 = sbr.rel (%p926_p5) target bundleno = 40 (0x28), region = 44 }
  0x21   : > { %264 = sbr.rel (!%p1299_p4) target bundleno = 40 (0x28), region = 48  ;;  %s266_s20 = sand.u32 (%p1299_p4), 1, %s1212_s28  }
  0x22   : > { %s928_s21 = sshll.u32 (%p1299_p4), %s1216_s29, 3  ;;  %s927_s22 = sshll.u32 (%p1299_p4), %s266_s20, 5 }
  0x23   : > { %s270_s25 = scalar_lea.vmem (%p1299_p4), %s1493_s0, %s928_s21  ;;  %s268_s26 = scalar_lea.vmem (%p1299_p4), [#allocation2], %s927_s22 }
  0x24   : > { %v304_v0 = vld [vmem:[%s270_s25] sm:$0xff] (%p1299_p4)  ;;  %v306_v1 = vld [vmem:[%s270_s25 + $0x10] sm:$0xff] (%p1299_p4) }
  0x25   : > { %v308_v2 = vld [vmem:[%s270_s25 + $0x20] sm:$0xff] (%p1299_p4)  ;;  %305 = vst [vmem:[%s268_s26] sm:$0xff] (%p1299_p4), %v304_v0  ;;  %307 = vst [vmem:[%s268_s26 + $0x8] sm:$0xff] (%p1299_p4), %v306_v1  ;;  %v310_v3 = vld [vmem:[%s270_s25 + $0x30] sm:$0xff] (%p1299_p4) }
  0x26   : > { %309 = vst [vmem:[%s268_s26 + $0x10] sm:$0xff] (%p1299_p4), %v308_v2  ;;  %311 = vst [vmem:[%s268_s26 + $0x18] sm:$0xff] (%p1299_p4), %v310_v3 }
  0x28 PF: > { %320 = sbr.rel (%p1305_p7) target bundleno = 953 (0x3b9), region = 86  ;;  %s323_s29 = sand.u32 (!%p1305_p7), 1, %s1208_s27  }
  0x29   : > { %s930_s10 = sshll.u32 (!%p1305_p7), %s323_s29, 5 }
  0x2a   : > { %s325_s11 = scalar_lea.vmem (!%p1305_p7), [#allocation2], %s930_s10 }
  0x2f   : > { %1203 = dma.done.wait (%p1142_p6), [#allocation4], 16  }
  0x30   : > { %1205 = vsyncadd (%p1142_p6), [#allocation4], 4294967280 }
  0x31   : > { %333 = sfence }
  0x32   : > { %v362_v4 = vld [vmem:[%s325_s11] sm:$0xff]  ;;  %v363_v5 = vld [vmem:[%s325_s11 + $0x8] sm:$0xff]  ;;  %v364_v6 = vld [vmem:[%s325_s11 + $0x10] sm:$0xff]  ;;  %vm394_vm0 = vcmask 261120   ;;  %v1219_v10 = vmov 0   ;;  %v1220_v53 = vmov 0.0|0.0  }
  0x33   : > { %v1082_v7 = vpack.c.bf16 %v363_v5, %v362_v4  ;;  %v365_v8 = vld [vmem:[%s325_s11 + $0x18] sm:$0xff]  ;;  %v366_v9 = vld [vmem:[%s1494_s1] sm:$0xff]  ;;  %1173 = vset.pattern.permute.xlu0 %v1219_v10  ;;  %1174 = vset.pattern.permute.xlu1 %v1219_v10  ;;  %v372_v13 = vld [vmem:[%s1495_s2 + $0x10] sm:$0xff]  ;;  %vm1221_vm1 = vmmov 0   ;;  %v1222_v54 = vmov 0.0   ;;  %vm692_vm2 = vcmask 523264  }
  0x34   : > { %v1086_v11 = vpack.c.bf16 %v365_v8, %v364_v6  ;;  %1002 = vmatprep.mubr.msk.f32.mxu0 %vm394_vm0, %v366_v9  ;;  %v370_v12 = vld [vmem:[%s1495_s2] sm:$0xff]  ;;  %386 = vperm.xlu1 %1174, %v372_v13   ;;  %v371_v14 = vld [vmem:[%s1495_s2 + $0x8] sm:$0xff]  ;;  %v373_v15 = vld [vmem:[%s1495_s2 + $0x18] sm:$0xff]  ;;  %s690_s22 = sld [smem:[#allocation3]]  ;;  %s945_s23 = sld [smem:[#allocation3 + $0x1]]  ;;  %vm855_vm3 = vcmask 57344  }
  0x35   : > { %1083 = vmatprep.subr.bf16.mxu0 %v1082_v7  ;;  %376 = vperm.xlu0 %1173, %v370_v12   ;;  %v367_v16 = vld [vmem:[%s1494_s1 + $0x8] sm:$0xff]  ;;  %v504_v17 = vld [vmem:[%s1497_s4] sm:$0xff]  ;;  %v368_v18 = vld [vmem:[%s1494_s1 + $0x10] sm:$0xff]  ;;  %p359_p4 = scmp.lt.s32.totalorder %s1284_s30, 1 }
  0x36   : > { %1085 = vmatpush3.bf16.msra.mxu0 %v1082_v7  ;;  %v505_v19 = vld [vmem:[%s1497_s4 + $0x8] sm:$0xff]  ;;  %v369_v20 = vld [vmem:[%s1494_s1 + $0x18] sm:$0xff]  ;;  %v506_v21 = vld [vmem:[%s1497_s4 + $0x10] sm:$0xff]  ;;  %1110 = vmatprep.subr.bf16.mxu1 %v1220_v53 }
  0x37   : > { %1087 = vmatprep.subr.bf16.mxu0 %v1086_v11  ;;  %v507_v22 = vld [vmem:[%s1497_s4 + $0x18] sm:$0xff]  ;;  %v508_v23 = vld [vmem:[%s1497_s4 + $0x20] sm:$0xff]  ;;  %v509_v24 = vld [vmem:[%s1497_s4 + $0x28] sm:$0xff]  ;;  %1079 = vmatprep.mubr.msk.f32.mxu1 %vm1221_vm1, %v1222_v54  ;;  %s1508_s30 = smov (!%p359_p4, %s1284_s30), 1 }
  0x38   : > { %391 = vperm.xlu1 %1174, %v373_v15   ;;  %v510_v25 = vld [vmem:[%s1497_s4 + $0x30] sm:$0xff]  ;;  %v511_v26 = vld [vmem:[%s1497_s4 + $0x38] sm:$0xff]  ;;  %v496_v27 = vld [vmem:[%s1496_s3] sm:$0xff]  ;;  %s361_s26 = scalar_lea.vmem %s1501_s8, %s1508_s30 }
  0x39   : > { %381 = vperm.xlu0 %1173, %v371_v14   ;;  %v497_v46 = vld [vmem:[%s1496_s3 + $0x8] sm:$0xff]  ;;  %v498_v47 = vld [vmem:[%s1496_s3 + $0x10] sm:$0xff]  ;;  %v499_v48 = vld [vmem:[%s1496_s3 + $0x18] sm:$0xff] }
  0x3a   : > { %1089 = vmatpush3.bf16.msra.mxu0 %v1086_v11  ;;  %v500_v49 = vld [vmem:[%s1496_s3 + $0x20] sm:$0xff]  ;;  %v501_v50 = vld [vmem:[%s1496_s3 + $0x28] sm:$0xff]  ;;  %v502_v51 = vld [vmem:[%s1496_s3 + $0x30] sm:$0xff] }
  0x3b   : > { %v503_v52 = vld [vmem:[%s1496_s3 + $0x38] sm:$0xff]  ;;  %v767_v55 = vld [vmem:[%s1499_s6] sm:$0xff]  ;;  %v768_v56 = vld [vmem:[%s1499_s6 + $0x8] sm:$0xff] }
  0x3c   : > { %519 = vperm.xlu1 %1174, %v505_v19   ;;  %v769_v57 = vld [vmem:[%s1499_s6 + $0x10] sm:$0xff]  ;;  %v1111_v58 = vpack.c.bf16 %v768_v56, %v767_v55  ;;  %v770_v59 = vld [vmem:[%s1499_s6 + $0x18] sm:$0xff]  ;;  %v771_v61 = vld [vmem:[%s1499_s6 + $0x20] sm:$0xff] }
  0x3d   : > { %1003 = vmatmul.mubr.msk.f32.vlgmr.msra.gmra.mrb[0].mxu0 %vm394_vm0, %v367_v16  ;;  %514 = vperm.xlu0 %1173, %v504_v17   ;;  %v1114_v60 = vpack.c.bf16 %v770_v59, %v769_v57  ;;  %v772_v62 = vld [vmem:[%s1499_s6 + $0x28] sm:$0xff]  ;;  %v773_v0 = vld [vmem:[%s1499_s6 + $0x30] sm:$0xff]  ;;  %v774_v1 = vld [vmem:[%s1499_s6 + $0x38] sm:$0xff]  ;;  %v784_v57 = vstv %s945_s23 }
  0x3e   : > { %1005 = vmatprep.mubr.msk.f32.mxu0 %vm394_vm0, %v368_v18  ;;  %1112 = vmatpush3.bf16.msra.mxu1 %v1111_v58  ;;  %v1117_v63 = vpack.c.bf16 %v772_v62, %v771_v61  ;;  %v1120_v2 = vpack.c.bf16 %v774_v1, %v773_v0  ;;  %v775_v3 = vld [vmem:[%s1499_s6 + $0x40] sm:$0xff]  ;;  %v776_v4 = vld [vmem:[%s1499_s6 + $0x48] sm:$0xff]  ;;  %v777_v6 = vld [vmem:[%s1499_s6 + $0x50] sm:$0xff] }
  0x3f   : > { %1113 = vmatprep.subr.bf16.mxu1 %v1220_v53  ;;  %v1123_v5 = vpack.c.bf16 %v776_v4, %v775_v3  ;;  %v778_v7 = vld [vmem:[%s1499_s6 + $0x58] sm:$0xff]  ;;  %v779_v9 = vld [vmem:[%s1499_s6 + $0x60] sm:$0xff]  ;;  %v780_v10 = vld [vmem:[%s1499_s6 + $0x68] sm:$0xff] }
  0x40   : > { %529 = vperm.xlu1 %1174, %v507_v22   ;;  %v1126_v8 = vpack.c.bf16 %v778_v7, %v777_v6  ;;  %v1129_v11 = vpack.c.bf16 %v780_v10, %v779_v9 }
  0x41   : > { %1006 = vmatmul.mubr.msk.f32.gmra.mrb[2].mxu0 %vm394_vm0, %v369_v20  ;;  %524 = vperm.xlu0 %1173, %v506_v21  }
  0x42   : > { %1016 = vmatprep.mubr.msk.f32.mxu0 %vm394_vm0, %v496_v27  ;;  %1115 = vmatpush3.bf16.msra.mxu1 %v1114_v60 }
  0x43   : > { %1116 = vmatprep.subr.bf16.mxu1 %v1220_v53 }
  0x44   : > { %539 = vperm.xlu1 %1174, %v509_v24  }
  0x45   : > { %534 = vperm.xlu0 %1173, %v508_v23  }
  0x46   : > { %1118 = vmatpush3.bf16.msra.mxu1 %v1117_v63 }
  0x47   : > { %1119 = vmatprep.subr.bf16.mxu1 %v1220_v53 }
  0x48   : > { %549 = vperm.xlu1 %1174, %v511_v26  }
  0x49   : > { %544 = vperm.xlu0 %1173, %v510_v25  }
  0x4a   : > { %1121 = vmatpush3.bf16.msra.mxu1 %v1120_v2 }
  0x4b   : > { %1122 = vmatprep.subr.bf16.mxu1 %v1220_v53 }
  0x4e   : > { %1124 = vmatpush3.bf16.msra.mxu1 %v1123_v5 }
  0x4f   : > { %1125 = vmatprep.subr.bf16.mxu1 %v1220_v53 }
  0x52   : > { %1127 = vmatpush3.bf16.msra.mxu1 %v1126_v8 }
  0x53   : > { %1128 = vmatprep.subr.bf16.mxu1 %v1220_v53 }
  0x56   : > { %1130 = vmatpush3.bf16.msra.mxu1 %v1129_v11 }
  0x57   : > { %1131 = vmatprep.subr.bf16.mxu1 %v1220_v53 }
  0xb3   : > { %v387_v29 = vpop.permute.xlu1 %386 }
  0xb4   : > { %v377_v28 = vpop.permute.xlu0 %376 }
  0xb7   : > { %v392_v36 = vpop.permute.xlu1 %391 }
  0xb8   : > { %v382_v30 = vpop.permute.xlu0 %381 }
  0xbb   : > { %v520_v12 = vpop.permute.xlu1 %519 }
  0xbc   : > { %v515_v13 = vpop.permute.xlu0 %514 }
  0xbf   : > { %v530_v14 = vpop.permute.xlu1 %529 }
  0xc0   : > { %v525_v16 = vpop.permute.xlu0 %524 }
  0xc3   : > { %v540_v25 = vpop.permute.xlu1 %539 }
 0x110   : > { %v1004_v31 = vpop.f32.mrb[0].mxu0 }
 0x111   : > { %v479_v32 = vadd.f32 %v1004_v31, %v382_v30  ;;  %v473_v33 = vpop.f32.mrb[1].mxu0 }
 0x112   : > { %v474_v34 = vadd.f32 %v473_v33, %v377_v28  ;;  %v535_v28 = vpop.permute.xlu0 %534 }
 0x113   : > { %v493_v35 = vmax.f32 %v479_v32, 0.0 }
 0x114   : > { %v492_v37 = vmax.f32 %v474_v34, 0.0  ;;  %v1007_v38 = vpop.f32.mrb[2].mxu0 }
 0x115   : > { %v489_v39 = vadd.f32 %v1007_v38, %v392_v36  ;;  %v483_v40 = vpop.f32.mrb[3].mxu0 }
 0x116   : > { %v1090_v41 = vpack.c.bf16 %v493_v35, %v492_v37  ;;  %v484_v42 = vadd.f32 %v483_v40, %v387_v29  ;;  %v550_v37 = vpop.permute.xlu1 %549  ;;  %v545_v40 = vpop.permute.xlu0 %544 }
 0x117   : > { %v495_v43 = vmax.f32 %v489_v39, 0.0 }
 0x118   : > { %v494_v44 = vmax.f32 %v484_v42, 0.0  ;;  %1091 = vmatprep.subr.bf16.mxu0 %v1090_v41 }
 0x119   : > { %1093 = vmatpush3.bf16.msra.mxu0 %v1090_v41 }
 0x11a   : > { %v1094_v45 = vpack.c.bf16 %v495_v43, %v494_v44 }
 0x11c   : > { %1095 = vmatprep.subr.bf16.mxu0 %v1094_v45 }
 0x11d   : > { %1097 = vmatpush3.bf16.msra.mxu0 %v1094_v45 }
 0x11e   : > { %1098 = vmatprep.subr.bf16.mxu0 %v1220_v53 }
 0x120   : > { %1017 = vmatmul.mubr.msk.f32.vlgmr.msra.gmra.mrb[4].mxu0 %vm394_vm0, %v497_v46 }
 0x121   : > { %1019 = vmatprep.mubr.msk.f32.mxu0 %vm394_vm0, %v498_v47 }
 0x124   : > { %1020 = vmatmul.mubr.msk.f32.gmra.mrb[6].mxu0 %vm394_vm0, %v499_v48  ;;  %v689_v48 = vld [vmem:[%s1498_s5] sm:$0x1] }
 0x125   : > { %1022 = vmatprep.mubr.msk.f32.mxu0 %vm394_vm0, %v500_v49  ;;  %v781_v49 = vld [vmem:[%s1499_s6 + $0x70] sm:$0xff] }
 0x128   : > { %1023 = vmatmul.mubr.msk.f32.gmra.mrb[8].mxu0 %vm394_vm0, %v501_v50  ;;  %v782_v50 = vld [vmem:[%s1499_s6 + $0x78] sm:$0xff] }
 0x129   : > { %1025 = vmatprep.mubr.msk.f32.mxu0 %vm394_vm0, %v502_v51  ;;  %v1132_v51 = vpack.c.bf16 %v782_v50, %v781_v49 }
 0x12b   : > { %1133 = vmatpush3.bf16.msra.mxu1 %v1132_v51 }
 0x12c   : > { %1026 = vmatmul.mubr.msk.f32.gmra.mrb[10].mxu0 %vm394_vm0, %v503_v52  ;;  %v691_v52 = vstv %s690_s22 }
 0x12d   : > { %1044 = vmatprep.mubr.msk.f32.mxu0 %vm1221_vm1, %v1222_v54 }
 0x1f3   : > { %v1018_v15 = vpop.f32.mrb[4].mxu0 }
 0x1f4   : > { %v648_v17 = vadd.f32 %v1018_v15, %v520_v12  ;;  %v642_v18 = vpop.f32.mrb[5].mxu0 }
 0x1f5   : > { %v643_v19 = vadd.f32 %v642_v18, %v515_v13 }
 0x1f6   : > { %v682_v20 = vmax.f32 %v648_v17, 0.0 }
 0x1f7   : > { %v681_v21 = vmax.f32 %v643_v19, 0.0  ;;  %v1021_v22 = vpop.f32.mrb[6].mxu0 }
 0x1f8   : > { %v658_v23 = vadd.f32 %v1021_v22, %v530_v14  ;;  %v652_v24 = vpop.f32.mrb[7].mxu0 }
 0x1f9   : > { %v1099_v26 = vpack.c.bf16 %v682_v20, %v681_v21  ;;  %v653_v27 = vadd.f32 %v652_v24, %v525_v16 }
 0x1fa   : > { %v684_v29 = vmax.f32 %v658_v23, 0.0 }
 0x1fb   : > { %v683_v30 = vmax.f32 %v653_v27, 0.0  ;;  %v1024_v31 = vpop.f32.mrb[8].mxu0  ;;  %1100 = vmatpush3.bf16.msra.mxu0 %v1099_v26 }
 0x1fc   : > { %v668_v32 = vadd.f32 %v1024_v31, %v540_v25  ;;  %v662_v33 = vpop.f32.mrb[9].mxu0  ;;  %1101 = vmatprep.subr.bf16.mxu0 %v1220_v53 }
 0x1fd   : > { %v1102_v34 = vpack.c.bf16 %v684_v29, %v683_v30  ;;  %v663_v35 = vadd.f32 %v662_v33, %v535_v28 }
 0x1fe   : > { %v686_v36 = vmax.f32 %v668_v32, 0.0 }
 0x1ff   : > { %v685_v38 = vmax.f32 %v663_v35, 0.0  ;;  %v1027_v39 = vpop.f32.mrb[10].mxu0  ;;  %1103 = vmatpush3.bf16.msra.mxu0 %v1102_v34 }
 0x200   : > { %v678_v41 = vadd.f32 %v1027_v39, %v550_v37  ;;  %v672_v42 = vpop.f32.mrb[11].mxu0  ;;  %1104 = vmatprep.subr.bf16.mxu0 %v1220_v53 }
 0x201   : > { %v1105_v43 = vpack.c.bf16 %v686_v36, %v685_v38  ;;  %v673_v44 = vadd.f32 %v672_v42, %v545_v40 }
 0x202   : > { %v688_v45 = vmax.f32 %v678_v41, 0.0 }
 0x203   : > { %v687_v46 = vmax.f32 %v673_v44, 0.0  ;;  %1106 = vmatpush3.bf16.msra.mxu0 %v1105_v43 }
 0x204   : > { %1107 = vmatprep.subr.bf16.mxu0 %v1220_v53 }
 0x205   : > { %v1108_v47 = vpack.c.bf16 %v688_v45, %v687_v46 }
 0x207   : > { %1109 = vmatpush3.bf16.msra.mxu0 %v1108_v47 }
 0x20a   : > { %1045 = vmatmul.mubr.msk.f32.vlgmr.msra.gmra.mrb[12].mxu0 %vm692_vm2, %v689_v48 }
 0x2dd   : > { %v762_v53 = vpop.f32.mrb[12].mxu0 }
 0x2de   : > { %v763_v54 = vadd.f32 %v762_v53, %v691_v52  ;;  %v1046_v55 = vpop.f32.mrb[13].mxu0 }
 0x2e0   : > { %v766_v56 = vmax.f32 %v763_v54, 0.0 }
 0x2e2   : > { %1080 = vmatmul.mubr.f32.vlgmr.msra.gmra.mrb[0].mxu1 %v766_v56 }
 0x3b5   : > { %v851_v58 = vpop.f32.mrb[0].mxu1 }
 0x3b6   : > { %v852_v59 = vadd.f32 %v851_v58, %v784_v57  ;;  %v1081_v60 = vpop.f32.mrb[1].mxu1 }
 0x3b8   : > { %856 = vst.msk [vmem:[%s361_s26] sm:$0x1] %vm855_vm3, %v852_v59 }
 0x3b9 PF: > { %p16_p6 = scmp.ge.s32.totalorder %s1287_s9, 4   ;;  %s1504_s27 = smov %s1212_s28 }
 0x3ba   : > { %s1505_s28 = smov %s1297_s12  ;;  %s1506_s29 = smov %s1287_s9 }
 0x3bb   :  { %18 = sbr.rel (!%p16_p6) target bundleno = 2 (0x2), region = 130 }
 0x3c2   :  { %874 = vsyncpa [#allocation4], 1 }
 0x3c3   :  { %876 = vsyncpa [#allocation4 + $0x1], 1 }

</bundles_post_ra>
